<compile_context>
chip_gen: v7x
topology: tpu7x:2x2x1
jax: 0.10.0
libtpu: 0.0.40
codegen_flags: <defaults>
</compile_context>

<pallas_src>
import functools
import numpy as np
import jax
import jax.numpy as jnp
from jax.experimental import pallas as pl
from jax.experimental.pallas import tpu as pltpu

_LN_EPS = 1e-5  # matches torch.nn.LayerNorm default
_LANE = 128


def _round_up(x, m):
    return (x + m - 1) // m * m


def _vmem_budget_bytes(needed):
    """Explicit scoped-VMEM budget with per-generation headroom."""
    cap = 100 * 1024 * 1024  # never ask for more than ~100 MiB (v5e/v6e have 128)
    try:
        info = pltpu.get_tpu_info()
        phys = getattr(info, "vmem_capacity_bytes", None)
        if phys:
            cap = min(cap, int(phys * 0.75))  # e.g. ~48 MiB on v7x (64 MiB physical)
    except Exception:
        cap = 48 * 1024 * 1024  # conservative fallback safe on all generations
    return int(min(max(needed + 4 * 1024 * 1024, 32 * 1024 * 1024), cap))


def _decoder_kernel(z_ref, w1_ref, b1_ref, w2_ref, b2_ref,
                    g_ref, bt_ref, w3_ref, b3_ref, o_ref, *, hid_dim):
    # fc1 + relu.  K = lat_dim is left un-padded: a small K is a single MXU
    # pass either way, and padding it would force an extra HBM copy of z.
    z = z_ref[...]
    h = jnp.dot(z, w1_ref[...], preferred_element_type=jnp.float32) + b1_ref[...]
    h = jnp.maximum(h, 0.0)

    # fc2 + relu (cast to the weight dtype so a bf16 path really uses bf16 MXU).
    h = jnp.dot(h.astype(w2_ref.dtype), w2_ref[...],
                preferred_element_type=jnp.float32) + b2_ref[...]
    h = jnp.maximum(h, 0.0)

    # LayerNorm over the *real* hidden dim in one statistics pass.
    # Padded hidden columns are exactly 0 (zero weight cols / zero bias), so
    # sum and sum-of-squares are unaffected; padded gamma/beta are 0 so the
    # padded columns of hn stay 0 and feed zero rows of W3.
    inv_h = 1.0 / float(hid_dim)
    s1 = jnp.sum(h, axis=-1, keepdims=True)
    s2 = jnp.sum(h * h, axis=-1, keepdims=True)
    mu = s1 * inv_h
    var = jnp.maximum(s2 * inv_h - mu * mu, 0.0)
    hn = (h - mu) * jax.lax.rsqrt(var + _LN_EPS)
    hn = hn * g_ref[...] + bt_ref[...]

    # fc3 (lane-dense output tile: Op is a multiple of 128).
    out = jnp.dot(hn.astype(w3_ref.dtype), w3_ref[...],
                  preferred_element_type=jnp.float32) + b3_ref[...]
    o_ref[...] = out.astype(o_ref.dtype)


def decoder_forward(z, w1, b1, w2, b2, gamma, beta, w3, b3, *,
                    block_rows=512, matmul_dtype=None):
    """z: (B, lat). Weights stored (in, out): w1 (lat,hid), w2 (hid,hid), w3 (hid,out).

    matmul_dtype=jnp.bfloat16 casts z and the weight matrices for bf16 MXU
    (recommended on v6e/v7x); None keeps the input dtype (exact f32 path).
    """
    B, L = z.shape
    H = w1.shape[1]
    O = w3.shape[1]

    # Lane-dense padding of the hidden / output feature axes (weights only).
    Hp = _round_up(H, _LANE)
    Op = _round_up(O, _LANE)
    w_dt = matmul_dtype if matmul_dtype is not None else w1.dtype

    def pad2(a, r, c):
        return jnp.pad(a, ((0, r - a.shape[0]), (0, c - a.shape[1])))

    w1p = pad2(w1, L, Hp).astype(w_dt)
    w2p = pad2(w2, Hp, Hp).astype(w_dt)
    w3p = pad2(w3, Hp, Op).astype(w_dt)
    b1p = jnp.pad(b1, (0, Hp - H)).reshape(1, Hp).astype(jnp.float32)
    b2p = jnp.pad(b2, (0, Hp - H)).reshape(1, Hp).astype(jnp.float32)
    gp = jnp.pad(gamma, (0, Hp - H)).reshape(1, Hp).astype(jnp.float32)
    btp = jnp.pad(beta, (0, Hp - H)).reshape(1, Hp).astype(jnp.float32)
    b3p = jnp.pad(b3, (0, Op - O)).reshape(1, Op).astype(jnp.float32)
    z_in = z.astype(w_dt) if matmul_dtype is not None else z

    # Row tiling: single tile for small batches; split batches just above one
    # tile into two so the "parallel" axis can use both v7x TensorCores;
    # otherwise stream block_rows-row tiles (ragged last tile handled by Pallas).
    if B <= block_rows:
        tB = B
    elif B < 2 * block_rows:
        tB = _round_up((B + 1) // 2, 8)
    else:
        tB = block_rows
    n_blocks = pl.cdiv(B, tB)

    # Explicit scoped-VMEM budget: double-buffered resident weights + streamed
    # z/out tiles + live (tB, Hp) f32 intermediates.
    itw = jnp.dtype(w_dt).itemsize
    itz = jnp.dtype(z_in.dtype).itemsize
    ito = jnp.dtype(z.dtype).itemsize
    weight_bytes = (L * Hp + Hp * Hp + Hp * Op) * itw + (4 * Hp + Op) * 4
    io_bytes = 2 * tB * (L * itz + Op * ito)
    interm_bytes = 4 * tB * Hp * 4
    vmem_limit = _vmem_budget_bytes(2 * weight_bytes + io_bytes + interm_bytes)

    out = pl.pallas_call(
        functools.partial(_decoder_kernel, hid_dim=H),
        out_shape=jax.ShapeDtypeStruct((B, Op), z.dtype),
        grid_spec=pltpu.PrefetchScalarGridSpec(
            num_scalar_prefetch=0,
            grid=(n_blocks,),
            in_specs=[
                pl.BlockSpec((tB, L), lambda i: (i, 0)),    # z rows (streamed)
                pl.BlockSpec((L, Hp), lambda i: (0, 0)),    # W1 (resident)
                pl.BlockSpec((1, Hp), lambda i: (0, 0)),    # b1
                pl.BlockSpec((Hp, Hp), lambda i: (0, 0)),   # W2 (resident)
                pl.BlockSpec((1, Hp), lambda i: (0, 0)),    # b2
                pl.BlockSpec((1, Hp), lambda i: (0, 0)),    # LN gamma
                pl.BlockSpec((1, Hp), lambda i: (0, 0)),    # LN beta
                pl.BlockSpec((Hp, Op), lambda i: (0, 0)),   # W3 (resident)
                pl.BlockSpec((1, Op), lambda i: (0, 0)),    # b3
            ],
            out_specs=pl.BlockSpec((tB, Op), lambda i: (i, 0)),  # lane-dense out
        ),
        compiler_params=pltpu.CompilerParams(
            dimension_semantics=("parallel",),   # independent row tiles (megacore)
            vmem_limit_bytes=vmem_limit,
        ),
    )(z_in, w1p, b1p, w2p, b2p, gp, btp, w3p, b3p)

    return out[:, :O] if Op != O else out


def decoder_ref(z, w1, b1, w2, b2, gamma, beta, w3, b3):
    """Pure-JAX reference with the same semantics as the PyTorch Decoder.forward."""
    h = jnp.maximum(z @ w1 + b1, 0.0)
    h = jnp.maximum(h @ w2 + b2, 0.0)
    mu = jnp.mean(h, axis=-1, keepdims=True)
    var = jnp.mean((h - mu) ** 2, axis=-1, keepdims=True)
    h = (h - mu) / jnp.sqrt(var + _LN_EPS) * gamma + beta
    return h @ w3 + b3


if __name__ == "__main__":
    lat_dim, hid_dim, out_dim = 16, 32, 8

    key = jax.random.PRNGKey(0)
    ks = jax.random.split(key, 9)
    w1 = 0.1 * jax.random.normal(ks[1], (lat_dim, hid_dim), dtype=jnp.float32)
    b1 = 0.1 * jax.random.normal(ks[2], (hid_dim,), dtype=jnp.float32)
    w2 = 0.1 * jax.random.normal(ks[3], (hid_dim, hid_dim), dtype=jnp.float32)
    b2 = 0.1 * jax.random.normal(ks[4], (hid_dim,), dtype=jnp.float32)
    gamma = 1.0 + 0.1 * jax.random.normal(ks[5], (hid_dim,), dtype=jnp.float32)
    beta = 0.1 * jax.random.normal(ks[6], (hid_dim,), dtype=jnp.float32)
    w3 = 0.1 * jax.random.normal(ks[7], (hid_dim, out_dim), dtype=jnp.float32)
    b3 = 0.1 * jax.random.normal(ks[8], (out_dim,), dtype=jnp.float32)

    # Main check: small batch, single row tile.
    B = 4
    z = jax.random.normal(ks[0], (B, lat_dim), dtype=jnp.float32)
    out = jax.block_until_ready(decoder_forward(z, w1, b1, w2, b2, gamma, beta, w3, b3))
    ref = decoder_ref(z, w1, b1, w2, b2, gamma, beta, w3, b3)
    np.testing.assert_allclose(np.asarray(out), np.asarray(ref), rtol=1e-4, atol=1e-5)

    # Secondary check: multi-tile grid with a ragged last row tile.
    B2 = 20
    z2 = jax.random.normal(jax.random.PRNGKey(1), (B2, lat_dim), dtype=jnp.float32)
    out2 = jax.block_until_ready(
        decoder_forward(z2, w1, b1, w2, b2, gamma, beta, w3, b3, block_rows=8))
    ref2 = decoder_ref(z2, w1, b1, w2, b2, gamma, beta, w3, b3)
    np.testing.assert_allclose(np.asarray(out2), np.asarray(ref2), rtol=1e-4, atol=1e-5)

    print("KERNEL_OK")
</pallas_src>

<mosaic_0001>
module attributes {stable_mosaic.version = 11 : i64} {
  func.func @_decoder_kernel(%arg0: i32, %arg1: memref<4x16xf32, #tpu.memory_space<vmem>>, %arg2: memref<16x128xf32, #tpu.memory_space<vmem>>, %arg3: memref<1x128xf32, #tpu.memory_space<vmem>>, %arg4: memref<128x128xf32, #tpu.memory_space<vmem>>, %arg5: memref<1x128xf32, #tpu.memory_space<vmem>>, %arg6: memref<1x128xf32, #tpu.memory_space<vmem>>, %arg7: memref<1x128xf32, #tpu.memory_space<vmem>>, %arg8: memref<128x128xf32, #tpu.memory_space<vmem>>, %arg9: memref<1x128xf32, #tpu.memory_space<vmem>>, %arg10: memref<4x128xf32, #tpu.memory_space<vmem>>) attributes {dimension_semantics = [#tpu.dimension_semantics<parallel>], iteration_bounds = array<i64: 1>, scalar_prefetch = 0 : i64, scratch_operands = 0 : i64, tpu.core_type = #tpu.core_type<tc>, window_params = [{transform_indices = @transform_0, window_bounds = array<i64: 4, 16>}, {pipeline_mode = #tpu.pipeline_mode<synchronous>, transform_indices = @transform_1, window_bounds = array<i64: 16, 128>}, {pipeline_mode = #tpu.pipeline_mode<synchronous>, transform_indices = @transform_2, window_bounds = array<i64: 1, 128>}, {pipeline_mode = #tpu.pipeline_mode<synchronous>, transform_indices = @transform_3, window_bounds = array<i64: 128, 128>}, {pipeline_mode = #tpu.pipeline_mode<synchronous>, transform_indices = @transform_4, window_bounds = array<i64: 1, 128>}, {pipeline_mode = #tpu.pipeline_mode<synchronous>, transform_indices = @transform_5, window_bounds = array<i64: 1, 128>}, {pipeline_mode = #tpu.pipeline_mode<synchronous>, transform_indices = @transform_6, window_bounds = array<i64: 1, 128>}, {pipeline_mode = #tpu.pipeline_mode<synchronous>, transform_indices = @transform_7, window_bounds = array<i64: 128, 128>}, {pipeline_mode = #tpu.pipeline_mode<synchronous>, transform_indices = @transform_8, window_bounds = array<i64: 1, 128>}, {transform_indices = @transform_9, window_bounds = array<i64: 4, 128>}]} {
    %c0 = arith.constant 0 : index
    %c0_0 = arith.constant 0 : index
    %0 = vector.load %arg1[%c0, %c0_0] : memref<4x16xf32, #tpu.memory_space<vmem>>, vector<4x16xf32>
    %c0_1 = arith.constant 0 : index
    %c0_2 = arith.constant 0 : index
    %1 = vector.load %arg2[%c0_1, %c0_2] : memref<16x128xf32, #tpu.memory_space<vmem>>, vector<16x128xf32>
    %cst = arith.constant dense<0.000000e+00> : vector<4x128xf32>
    %2 = tpu.matmul %0, %1, %cst {dimension_numbers = #tpu.dot_dimension_numbers<[1], [0], [0], [1], [0, 0, 1, 1], [], []>} : vector<4x16xf32>, vector<16x128xf32>, vector<4x128xf32> -> vector<4x128xf32>
    %c0_3 = arith.constant 0 : index
    %c0_4 = arith.constant 0 : index
    %3 = vector.load %arg3[%c0_3, %c0_4] : memref<1x128xf32, #tpu.memory_space<vmem>>, vector<1x128xf32>
    %4 = vector.broadcast %3 : vector<1x128xf32> to vector<4x128xf32>
    %5 = arith.addf %2, %4 : vector<4x128xf32>
    %cst_5 = arith.constant 0.000000e+00 : f32
    %6 = vector.broadcast %cst_5 : f32 to vector<4x128xf32>
    %7 = arith.maximumf %5, %6 : vector<4x128xf32>
    %c0_6 = arith.constant 0 : index
    %c0_7 = arith.constant 0 : index
    %8 = vector.load %arg4[%c0_6, %c0_7] : memref<128x128xf32, #tpu.memory_space<vmem>>, vector<128x128xf32>
    %cst_8 = arith.constant dense<0.000000e+00> : vector<4x128xf32>
    %9 = tpu.matmul %7, %8, %cst_8 {dimension_numbers = #tpu.dot_dimension_numbers<[1], [0], [0], [1], [0, 0, 1, 1], [], []>} : vector<4x128xf32>, vector<128x128xf32>, vector<4x128xf32> -> vector<4x128xf32>
    %c0_9 = arith.constant 0 : index
    %c0_10 = arith.constant 0 : index
    %10 = vector.load %arg5[%c0_9, %c0_10] : memref<1x128xf32, #tpu.memory_space<vmem>>, vector<1x128xf32>
    %11 = vector.broadcast %10 : vector<1x128xf32> to vector<4x128xf32>
    %12 = arith.addf %9, %11 : vector<4x128xf32>
    %cst_11 = arith.constant 0.000000e+00 : f32
    %13 = vector.broadcast %cst_11 : f32 to vector<4x128xf32>
    %14 = arith.maximumf %12, %13 : vector<4x128xf32>
    %cst_12 = arith.constant dense<0.000000e+00> : vector<4xf32>
    %15 = vector.multi_reduction <add>, %14, %cst_12 [1] : vector<4x128xf32> to vector<4xf32>
    %16 = vector.shape_cast %15 : vector<4xf32> to vector<4x1xf32>
    %17 = arith.mulf %14, %14 : vector<4x128xf32>
    %cst_13 = arith.constant dense<0.000000e+00> : vector<4xf32>
    %18 = vector.multi_reduction <add>, %17, %cst_13 [1] : vector<4x128xf32> to vector<4xf32>
    %19 = vector.shape_cast %18 : vector<4xf32> to vector<4x1xf32>
    %cst_14 = arith.constant 3.125000e-02 : f32
    %20 = vector.broadcast %cst_14 : f32 to vector<4x1xf32>
    %21 = arith.mulf %16, %20 : vector<4x1xf32>
    %cst_15 = arith.constant 3.125000e-02 : f32
    %22 = vector.broadcast %cst_15 : f32 to vector<4x1xf32>
    %23 = arith.mulf %19, %22 : vector<4x1xf32>
    %24 = arith.mulf %21, %21 : vector<4x1xf32>
    %25 = arith.subf %23, %24 : vector<4x1xf32>
    %cst_16 = arith.constant 0.000000e+00 : f32
    %26 = vector.broadcast %cst_16 : f32 to vector<4x1xf32>
    %27 = arith.maximumf %25, %26 : vector<4x1xf32>
    %28 = vector.broadcast %21 : vector<4x1xf32> to vector<4x128xf32>
    %29 = arith.subf %14, %28 : vector<4x128xf32>
    %cst_17 = arith.constant 9.99999974E-6 : f32
    %30 = vector.broadcast %cst_17 : f32 to vector<4x1xf32>
    %31 = arith.addf %27, %30 : vector<4x1xf32>
    %32 = math.rsqrt %31 : vector<4x1xf32>
    %33 = vector.broadcast %32 : vector<4x1xf32> to vector<4x128xf32>
    %34 = arith.mulf %29, %33 : vector<4x128xf32>
    %c0_18 = arith.constant 0 : index
    %c0_19 = arith.constant 0 : index
    %35 = vector.load %arg6[%c0_18, %c0_19] : memref<1x128xf32, #tpu.memory_space<vmem>>, vector<1x128xf32>
    %36 = vector.broadcast %35 : vector<1x128xf32> to vector<4x128xf32>
    %37 = arith.mulf %34, %36 : vector<4x128xf32>
    %c0_20 = arith.constant 0 : index
    %c0_21 = arith.constant 0 : index
    %38 = vector.load %arg7[%c0_20, %c0_21] : memref<1x128xf32, #tpu.memory_space<vmem>>, vector<1x128xf32>
    %39 = vector.broadcast %38 : vector<1x128xf32> to vector<4x128xf32>
    %40 = arith.addf %37, %39 : vector<4x128xf32>
    %c0_22 = arith.constant 0 : index
    %c0_23 = arith.constant 0 : index
    %41 = vector.load %arg8[%c0_22, %c0_23] : memref<128x128xf32, #tpu.memory_space<vmem>>, vector<128x128xf32>
    %cst_24 = arith.constant dense<0.000000e+00> : vector<4x128xf32>
    %42 = tpu.matmul %40, %41, %cst_24 {dimension_numbers = #tpu.dot_dimension_numbers<[1], [0], [0], [1], [0, 0, 1, 1], [], []>} : vector<4x128xf32>, vector<128x128xf32>, vector<4x128xf32> -> vector<4x128xf32>
    %c0_25 = arith.constant 0 : index
    %c0_26 = arith.constant 0 : index
    %43 = vector.load %arg9[%c0_25, %c0_26] : memref<1x128xf32, #tpu.memory_space<vmem>>, vector<1x128xf32>
    %44 = vector.broadcast %43 : vector<1x128xf32> to vector<4x128xf32>
    %45 = arith.addf %42, %44 : vector<4x128xf32>
    %c0_27 = arith.constant 0 : index
    %c0_28 = arith.constant 0 : index
    %46 = vector.load %arg10[%c0_27, %c0_28] : memref<4x128xf32, #tpu.memory_space<vmem>>, vector<4x128xf32>
    tpu.vector_store %arg10[%c0_27, %c0_28], %45 {strides = array<i32>} : memref<4x128xf32, #tpu.memory_space<vmem>>, vector<4x128xf32>,
    return
  }
  func.func @transform_0(%arg0: i32) -> (i32, i32) {
    %c0_i32 = arith.constant 0 : i32
    %c0_i32_0 = arith.constant 0 : i32
    return %arg0, %c0_i32 : i32, i32
  }
  func.func @transform_1(%arg0: i32) -> (i32, i32) {
    %c0_i32 = arith.constant 0 : i32
    %c0_i32_0 = arith.constant 0 : i32
    %c0_i32_1 = arith.constant 0 : i32
    return %c0_i32, %c0_i32_0 : i32, i32
  }
  func.func @transform_2(%arg0: i32) -> (i32, i32) {
    %c0_i32 = arith.constant 0 : i32
    %c0_i32_0 = arith.constant 0 : i32
    %c0_i32_1 = arith.constant 0 : i32
    return %c0_i32, %c0_i32_0 : i32, i32
  }
  func.func @transform_3(%arg0: i32) -> (i32, i32) {
    %c0_i32 = arith.constant 0 : i32
    %c0_i32_0 = arith.constant 0 : i32
    %c0_i32_1 = arith.constant 0 : i32
    return %c0_i32, %c0_i32_0 : i32, i32
  }
  func.func @transform_4(%arg0: i32) -> (i32, i32) {
    %c0_i32 = arith.constant 0 : i32
    %c0_i32_0 = arith.constant 0 : i32
    %c0_i32_1 = arith.constant 0 : i32
    return %c0_i32, %c0_i32_0 : i32, i32
  }
  func.func @transform_5(%arg0: i32) -> (i32, i32) {
    %c0_i32 = arith.constant 0 : i32
    %c0_i32_0 = arith.constant 0 : i32
    %c0_i32_1 = arith.constant 0 : i32
    return %c0_i32, %c0_i32_0 : i32, i32
  }
  func.func @transform_6(%arg0: i32) -> (i32, i32) {
    %c0_i32 = arith.constant 0 : i32
    %c0_i32_0 = arith.constant 0 : i32
    %c0_i32_1 = arith.constant 0 : i32
    return %c0_i32, %c0_i32_0 : i32, i32
  }
  func.func @transform_7(%arg0: i32) -> (i32, i32) {
    %c0_i32 = arith.constant 0 : i32
    %c0_i32_0 = arith.constant 0 : i32
    %c0_i32_1 = arith.constant 0 : i32
    return %c0_i32, %c0_i32_0 : i32, i32
  }
  func.func @transform_8(%arg0: i32) -> (i32, i32) {
    %c0_i32 = arith.constant 0 : i32
    %c0_i32_0 = arith.constant 0 : i32
    %c0_i32_1 = arith.constant 0 : i32
    return %c0_i32, %c0_i32_0 : i32, i32
  }
  func.func @transform_9(%arg0: i32) -> (i32, i32) {
    %c0_i32 = arith.constant 0 : i32
    %c0_i32_0 = arith.constant 0 : i32
    return %arg0, %c0_i32 : i32, i32
  }
}

</mosaic_0001>

<bundles_post_ra>
// kernel: tpu_custom_call.1
= control target key start
LH: loop header
LB: loop body
LE: loop exit
PB: predicated region body
PF: predicated region fallthrough
CT: control target
= control target key end

     0   :  { %14 = vsyncpa [#allocation3], 0  ;;  %s874_s0 = inlined_call_operand.hbm [shape: f32[4,16], index: 0, kind: input, shape index: {}]   ;;  %s875_s1 = inlined_call_operand.hbm [shape: f32[16,128], index: 1, kind: input, shape index: {}]   ;;  %s876_s2 = inlined_call_operand.vmem [shape: f32[1,128], index: 2, kind: input, shape index: {}]   ;;  %s877_s3 = inlined_call_operand.hbm [shape: f32[128,128], index: 3, kind: input, shape index: {}]   ;;  %s878_s4 = inlined_call_operand.vmem [shape: f32[1,128], index: 4, kind: input, shape index: {}]   ;;  %s879_s5 = inlined_call_operand.vmem [shape: f32[1,128], index: 5, kind: input, shape index: {}]   ;;  %s880_s6 = inlined_call_operand.vmem [shape: f32[1,128], index: 6, kind: input, shape index: {}]   ;;  %s881_s7 = inlined_call_operand.hbm [shape: f32[128,128], index: 7, kind: input, shape index: {}]   ;;  %s882_s8 = inlined_call_operand.vmem [shape: f32[1,128], index: 8, kind: input, shape index: {}]   ;;  %s883_s9 = inlined_call_operand.hbm [shape: f32[4,128], index: 9, kind: output, shape index: {}]  }
   0x1   :  { %15 = vsyncpa [#allocation6], 0 }
   0x2   :  { %16 = vsyncpa [#allocation9], 0 }
   0x3   :  { %17 = vsyncpa [#allocation4], 0  ;;  %s710_s30 = smov [#allocation5]   ;;  %s592_s13 = scalar_lea.hbm %s875_s1, 256 }
   0x4   :  { %s33_s10 = sshll.u32 %s710_s30, 4  ;;  %p593_p0 = scmp.ne.s32.totalorder %s875_s1, %s592_s13  ;;  %s34_s10 = int_to_ptr.vmem [resolvable:$true] %s33_s10 }
   0x5   :  { %p596_p1 = scmp.lt.u32.totalorder %s592_s13, %s875_s1 }
   0x7   :  { %p598_p2 = pnand %p596_p1, %p593_p0 }
   0x9   :  { %601 = shalt.err (!%p598_p2)
}
   0xa   :  { %s602_s18 = scalar_lea.vmem %s34_s10, 256  ;;  %p607_p4 = scmp.lt.s32.totalorder %s34_s10, %s34_s10 }
   0xb   :  { %p603_p3 = scmp.ne.s32.totalorder %s34_s10, %s602_s18  ;;  %p608_p5 = scmp.lt.s32.totalorder %s602_s18, %s602_s18 }
   0xd   :  { %p609_p6 = por %p608_p5, %p607_p4 }
   0xf   :  { %p610_p7 = pnand %p609_p6, %p603_p3 }
  0x11   :  { %613 = shalt.err (!%p610_p7)
}
  0x12   :  { %s711_s19 = smov 128   ;;  %s712_s20 = smov 8  }
  0x13   :  { %39 = dma.hbm_to_vmem [thread:$0]  %s875_s1, 256, %s34_s10, [#allocation6], %s711_s19, %s711_s19, %s712_s20  }
  0x14   :  { %s713_s23 = smov [#allocation2]   ;;  %s714_s25 = smov [#allocation7]  }
  0x15   :  { %s24_s24 = sshll.u32 %s713_s23, 4  ;;  %s47_s26 = sshll.u32 %s714_s25, 4  ;;  %s25_s24 = int_to_ptr.vmem [resolvable:$true] %s24_s24  ;;  %s48_s26 = int_to_ptr.vmem [resolvable:$true] %s47_s26 }
  0x16   :  { %s614_s29 = scalar_lea.hbm %s874_s0, 64 }
  0x17   :  { %p615_p8 = scmp.ne.s32.totalorder %s874_s0, %s614_s29  ;;  %p618_p9 = scmp.lt.u32.totalorder %s614_s29, %s874_s0 }
  0x19   :  { %p620_p10 = pnand %p618_p9, %p615_p8 }
  0x1b   :  { %623 = shalt.err (!%p620_p10)
}
  0x1c   :  { %s624_s1 = scalar_lea.vmem %s25_s24, 64  ;;  %p629_p12 = scmp.lt.s32.totalorder %s25_s24, %s25_s24 }
  0x1d   :  { %p625_p11 = scmp.ne.s32.totalorder %s25_s24, %s624_s1  ;;  %p630_p13 = scmp.lt.s32.totalorder %s624_s1, %s624_s1 }
  0x1f   :  { %p631_p0 = por %p630_p13, %p629_p12 }
  0x21   :  { %p632_p1 = pnand %p631_p0, %p625_p11 }
  0x23   :  { %635 = shalt.err (!%p632_p1)
}
  0x24   :  { %27 = dma.hbm_to_vmem [thread:$0]  %s874_s0, 64, %s25_s24, [#allocation3]  }
  0x25   :  { %s636_s17 = scalar_lea.hbm %s877_s3, 2048 }
  0x26   :  { %p637_p2 = scmp.ne.s32.totalorder %s877_s3, %s636_s17  ;;  %p640_p3 = scmp.lt.u32.totalorder %s636_s17, %s877_s3 }
  0x28   :  { %p642_p4 = pnand %p640_p3, %p637_p2 }
  0x2a   :  { %645 = shalt.err (!%p642_p4)
}
  0x2b   :  { %s646_s25 = scalar_lea.vmem %s48_s26, 2048  ;;  %p651_p6 = scmp.lt.s32.totalorder %s48_s26, %s48_s26 }
  0x2c   :  { %p647_p5 = scmp.ne.s32.totalorder %s48_s26, %s646_s25  ;;  %p652_p7 = scmp.lt.s32.totalorder %s646_s25, %s646_s25 }
  0x2e   :  { %p653_p8 = por %p652_p7, %p651_p6 }
  0x30   :  { %p654_p9 = pnand %p653_p8, %p647_p5 }
  0x32   :  { %657 = shalt.err (!%p654_p9)
}
  0x33   :  { %53 = dma.hbm_to_vmem [thread:$0]  %s877_s3, 2048, %s48_s26, [#allocation6], %s711_s19, %s711_s19, %s712_s20  }
  0x34   :  { %s715_s27 = smov [#allocation8]   ;;  %s658_s11 = scalar_lea.hbm %s881_s7, 2048 }
  0x35   :  { %s65_s28 = sshll.u32 %s715_s27, 4  ;;  %p659_p10 = scmp.ne.s32.totalorder %s881_s7, %s658_s11  ;;  %s66_s28 = int_to_ptr.vmem [resolvable:$true] %s65_s28 }
  0x36   :  { %p662_p11 = scmp.lt.u32.totalorder %s658_s11, %s881_s7 }
  0x38   :  { %p664_p12 = pnand %p662_p11, %p659_p10 }
  0x3a   :  { %667 = shalt.err (!%p664_p12)
}
  0x3b   :  { %s668_s14 = scalar_lea.vmem %s66_s28, 2048  ;;  %p673_p0 = scmp.lt.s32.totalorder %s66_s28, %s66_s28 }
  0x3c   :  { %p669_p13 = scmp.ne.s32.totalorder %s66_s28, %s668_s14  ;;  %p674_p1 = scmp.lt.s32.totalorder %s668_s14, %s668_s14 }
  0x3e   :  { %p675_p2 = por %p674_p1, %p673_p0 }
  0x40   :  { %p676_p3 = pnand %p675_p2, %p669_p13 }
  0x42   :  { %679 = shalt.err (!%p676_p3)
}
  0x43   :  { %71 = dma.hbm_to_vmem [thread:$0]  %s881_s7, 2048, %s66_s28, [#allocation9], %s711_s19, %s711_s19, %s712_s20  }
  0x44   :  { %702 = dma.done.wait [#allocation3], 64  }
  0x45   :  { %703 = vsyncadd [#allocation3], 4294967232 }
  0x46   :  { %704 = dma.done.wait [#allocation6], 2304  }
  0x47   :  { %705 = vsyncadd [#allocation6], 4294964992 }
  0x48   :  { %706 = dma.done.wait [#allocation9], 2048  }
  0x49   :  { %707 = vsyncadd [#allocation9], 4294965248  ;;  %v716_v0 = vmov 0.0|0.0   ;;  %vm717_vm0 = vmmov 0   ;;  %v718_v1 = vmov 0.0   ;;  %v87_v2 = vld [vmem:[#allocation5] sm:$0xff] }
  0x4a   :  { %529 = vmatprep.subr.bf16.mxu0 %v716_v0  ;;  %456 = vmatprep.mubr.msk.f32.mxu0 %vm717_vm0, %v718_v1  ;;  %v88_v3 = vld [vmem:[#allocation5 + $0x8] sm:$0xff]  ;;  %v171_v5 = vld [vmem:[#allocation7] sm:$0xff]  ;;  %v172_v6 = vld [vmem:[#allocation7 + $0x8] sm:$0xff]  ;;  %vm96_vm1 = vcmask 130048   ;;  %vm265_vm2 = vcmask 1043456   ;;  %s719_s22 = smov [#allocation10]  }
  0x4b   :  { %532 = vmatprep.subr.bf16.mxu1 %v716_v0  ;;  %491 = vmatprep.mubr.msk.f32.mxu1 %vm717_vm0, %v718_v1  ;;  %v530_v4 = vpack.c.bf16 %v88_v3, %v87_v2  ;;  %v173_v7 = vld [vmem:[#allocation7 + $0x10] sm:$0xff]  ;;  %v533_v8 = vpack.c.bf16 %v172_v6, %v171_v5  ;;  %v174_v9 = vld [vmem:[#allocation7 + $0x18] sm:$0xff]  ;;  %v86_v10 = vld [vmem:[#allocation2] sm:$0xf]  ;;  %s398_s23 = sshll.u32 %s719_s22, 4  ;;  %s399_s23 = int_to_ptr.vmem [resolvable:$true] %s398_s23 }
  0x4c   :  { %v536_v11 = vpack.c.bf16 %v174_v9, %v173_v7  ;;  %v175_v12 = vld [vmem:[#allocation7 + $0x20] sm:$0xff]  ;;  %v176_v13 = vld [vmem:[#allocation7 + $0x28] sm:$0xff]  ;;  %v177_v15 = vld [vmem:[#allocation7 + $0x30] sm:$0xff]  ;;  %p685_p5 = scmp.lt.s32.totalorder %s399_s23, %s399_s23 }
  0x4d   :  { %531 = vmatpush3.bf16.msra.mxu0 %v530_v4  ;;  %534 = vmatpush3.bf16.msra.mxu1 %v533_v8  ;;  %v539_v14 = vpack.c.bf16 %v176_v13, %v175_v12  ;;  %v178_v16 = vld [vmem:[#allocation7 + $0x38] sm:$0xff]  ;;  %v179_v18 = vld [vmem:[#allocation7 + $0x40] sm:$0xff]  ;;  %v180_v19 = vld [vmem:[#allocation7 + $0x48] sm:$0xff] }
  0x4e   :  { %556 = vmatprep.subr.bf16.mxu0 %v716_v0  ;;  %535 = vmatprep.subr.bf16.mxu1 %v716_v0  ;;  %v542_v17 = vpack.c.bf16 %v178_v16, %v177_v15  ;;  %v545_v20 = vpack.c.bf16 %v180_v19, %v179_v18  ;;  %v181_v21 = vld [vmem:[#allocation7 + $0x50] sm:$0xff]  ;;  %v182_v22 = vld [vmem:[#allocation7 + $0x58] sm:$0xff]  ;;  %v183_v24 = vld [vmem:[#allocation7 + $0x60] sm:$0xff] }
  0x4f   :  { %v548_v23 = vpack.c.bf16 %v182_v22, %v181_v21  ;;  %v184_v25 = vld [vmem:[#allocation7 + $0x68] sm:$0xff]  ;;  %v185_v27 = vld [vmem:[#allocation7 + $0x70] sm:$0xff]  ;;  %v186_v28 = vld [vmem:[#allocation7 + $0x78] sm:$0xff] }
  0x50   :  { %457 = vmatmul.mubr.msk.f32.vlgmr.msra.gmra.mrb[0].mxu0 %vm96_vm1, %v86_v10  ;;  %v551_v26 = vpack.c.bf16 %v184_v25, %v183_v24  ;;  %v554_v29 = vpack.c.bf16 %v186_v28, %v185_v27  ;;  %v409_v30 = vld [vmem:[%s876_s2] ss:$0 sm:$0xff]  ;;  %v298_v35 = vld [vmem:[#allocation8] sm:$0xff]  ;;  %v300_v46 = vld [vmem:[#allocation8 + $0x10] sm:$0xff] }
  0x51   :  { %526 = vmatprep.mubr.msk.f32.mxu0 %vm717_vm0, %v718_v1  ;;  %537 = vmatpush3.bf16.msra.mxu1 %v536_v11  ;;  %v299_v36 = vld [vmem:[#allocation8 + $0x8] sm:$0xff]  ;;  %v301_v47 = vld [vmem:[#allocation8 + $0x18] sm:$0xff]  ;;  %v302_v49 = vld [vmem:[#allocation8 + $0x20] sm:$0xff] }
  0x52   :  { %538 = vmatprep.subr.bf16.mxu1 %v716_v0  ;;  %v557_v37 = vpack.c.bf16 %v299_v36, %v298_v35  ;;  %v411_v38 = vld [vmem:[%s878_s4] ss:$0 sm:$0xff]  ;;  %v560_v48 = vpack.c.bf16 %v301_v47, %v300_v46  ;;  %v304_v52 = vld [vmem:[#allocation8 + $0x30] sm:$0xff]  ;;  %v305_v53 = vld [vmem:[#allocation8 + $0x38] sm:$0xff] }
  0x53   :  { %v303_v50 = vld [vmem:[#allocation8 + $0x28] sm:$0xff]  ;;  %v566_v54 = vpack.c.bf16 %v305_v53, %v304_v52  ;;  %v306_v55 = vld [vmem:[#allocation8 + $0x40] sm:$0xff]  ;;  %v308_v58 = vld [vmem:[#allocation8 + $0x50] sm:$0xff] }
  0x54   :  { %558 = vmatpush3.bf16.msra.mxu0 %v557_v37  ;;  %v563_v51 = vpack.c.bf16 %v303_v50, %v302_v49  ;;  %v307_v56 = vld [vmem:[#allocation8 + $0x48] sm:$0xff]  ;;  %v309_v59 = vld [vmem:[#allocation8 + $0x58] sm:$0xff]  ;;  %v310_v61 = vld [vmem:[#allocation8 + $0x60] sm:$0xff] }
  0x55   :  { %540 = vmatpush3.bf16.msra.mxu1 %v539_v14  ;;  %559 = vmatprep.subr.bf16.mxu0 %v716_v0  ;;  %v569_v57 = vpack.c.bf16 %v307_v56, %v306_v55  ;;  %v572_v60 = vpack.c.bf16 %v309_v59, %v308_v58  ;;  %v311_v62 = vld [vmem:[#allocation8 + $0x68] sm:$0xff]  ;;  %v312_v1 = vld [vmem:[#allocation8 + $0x70] sm:$0xff]  ;;  %v313_v2 = vld [vmem:[#allocation8 + $0x78] sm:$0xff] }
  0x56   :  { %541 = vmatprep.subr.bf16.mxu1 %v716_v0  ;;  %v575_v63 = vpack.c.bf16 %v311_v62, %v310_v61  ;;  %v578_v3 = vpack.c.bf16 %v313_v2, %v312_v1  ;;  %v412_v14 = vld [vmem:[%s879_s5] ss:$0 sm:$0xff]  ;;  %s680_s5 = scalar_lea.vmem %s399_s23, 64 }
  0x57   :  { %v414_v18 = vld [vmem:[%s882_s8] ss:$0 sm:$0xff]  ;;  %p681_p4 = scmp.ne.s32.totalorder %s399_s23, %s680_s5  ;;  %p686_p6 = scmp.lt.s32.totalorder %s680_s5, %s680_s5 }
  0x58   :  { %561 = vmatpush3.bf16.msra.mxu0 %v560_v48 }
  0x59   :  { %543 = vmatpush3.bf16.msra.mxu1 %v542_v17  ;;  %562 = vmatprep.subr.bf16.mxu0 %v716_v0  ;;  %p687_p7 = por %p686_p6, %p685_p5 }
  0x5a   :  { %544 = vmatprep.subr.bf16.mxu1 %v716_v0 }
  0x5b   :  { %p688_p8 = pnand %p687_p7, %p681_p4 }
  0x5c   :  { %564 = vmatpush3.bf16.msra.mxu0 %v563_v51 }
  0x5d   :  { %546 = vmatpush3.bf16.msra.mxu1 %v545_v20  ;;  %565 = vmatprep.subr.bf16.mxu0 %v716_v0 }
  0x5e   :  { %547 = vmatprep.subr.bf16.mxu1 %v716_v0 }
  0x60   :  { %567 = vmatpush3.bf16.msra.mxu0 %v566_v54 }
  0x61   :  { %549 = vmatpush3.bf16.msra.mxu1 %v548_v23  ;;  %568 = vmatprep.subr.bf16.mxu0 %v716_v0 }
  0x62   :  { %550 = vmatprep.subr.bf16.mxu1 %v716_v0 }
  0x64   :  { %570 = vmatpush3.bf16.msra.mxu0 %v569_v57 }
  0x65   :  { %552 = vmatpush3.bf16.msra.mxu1 %v551_v26  ;;  %571 = vmatprep.subr.bf16.mxu0 %v716_v0 }
  0x66   :  { %553 = vmatprep.subr.bf16.mxu1 %v716_v0 }
  0x68   :  { %573 = vmatpush3.bf16.msra.mxu0 %v572_v60 }
  0x69   :  { %555 = vmatpush3.bf16.msra.mxu1 %v554_v29  ;;  %574 = vmatprep.subr.bf16.mxu0 %v716_v0 }
  0x6c   :  { %576 = vmatpush3.bf16.msra.mxu0 %v575_v63 }
  0x6d   :  { %577 = vmatprep.subr.bf16.mxu0 %v716_v0  ;;  %v413_v0 = vld [vmem:[%s880_s6] ss:$0 sm:$0xff] }
  0x70   :  { %579 = vmatpush3.bf16.msra.mxu0 %v578_v3 }
 0x123   :  { %v166_v31 = vpop.f32.mrb[0].mxu0 }
 0x124   :  { %v167_v32 = vadd.f32 %v409_v30, %v166_v31  ;;  %v458_v33 = vpop.f32.mrb[1].mxu0 }
 0x126   :  { %v170_v34 = vmax.f32 %v167_v32, 0.0 }
 0x128   :  { %492 = vmatmul.mubr.f32.vlgmr.msra.gmra.mrb[0].mxu1 %v170_v34 }
 0x1fb   :  { %v260_v39 = vpop.f32.mrb[0].mxu1 }
 0x1fc   :  { %v261_v40 = vadd.f32 %v411_v38, %v260_v39  ;;  %v493_v41 = vpop.f32.mrb[1].mxu1 }
 0x1fe   :  { %v264_v42 = vmax.f32 %v261_v40, 0.0 }
 0x200   :  { %v266_v43 = vsel %vm265_vm2, %v264_v42, 0.0  ;;  %v269_v44 = vmul.f32 %v264_v42, %v264_v42 }
 0x201   :  { %267 = vadd.xlane.f32.xlu0 %v266_v43 }
 0x202   :  { %v270_v45 = vsel %vm265_vm2, %v269_v44, 0.0 }
 0x205   :  { %271 = vadd.xlane.f32.xlu0 %v270_v45 }
 0x28e   :  { %v268_v4 = vpop.xlane.xlu0 %267 }
 0x28f   :  { %v273_v5 = vmul.f32 0.03125, %v268_v4 }
 0x291   :  { %v275_v7 = vmul.f32 %v273_v5, %v273_v5  ;;  %v278_v12 = vsub.f32 %v264_v42, %v273_v5 }
 0x292   :  { %v272_v6 = vpop.xlane.xlu0 %271 }
 0x293   :  { %v274_v8 = vmul.f32 0.03125, %v272_v6 }
 0x295   :  { %v276_v9 = vsub.f32 %v274_v8, %v275_v7 }
 0x297   :  { %v277_v10 = vmax.f32 %v276_v9, 0.0 }
 0x299   :  { %v279_v11 = vadd.f32 1e-05, %v277_v10 }
 0x29b   :  { %590 = vrsqrt.f32 %v279_v11 }
 0x2a5   :  { %v591_v13 = vpop.eup %590 }
 0x2a6   :  { %v281_v15 = vmul.f32 %v591_v13, %v278_v12 }
 0x2a8   :  { %v289_v16 = vmul.f32 %v412_v14, %v281_v15 }
 0x2aa   :  { %v297_v17 = vadd.f32 %v413_v0, %v289_v16 }
 0x2ac   :  { %527 = vmatmul.mubr.f32.vlgmr.msra.gmra.mrb[2].mxu0 %v297_v17 }
 0x37f   :  { %v387_v19 = vpop.f32.mrb[2].mxu0 }
 0x380   :  { %v388_v20 = vadd.f32 %v414_v18, %v387_v19  ;;  %v528_v21 = vpop.f32.mrb[3].mxu0 }
 0x382   :  { %391 = vst [vmem:[#allocation10] sm:$0xf] %v388_v20 }
 0x383   :  { %691 = shalt.err (!%p688_p8)
}
 0x384   :  { %s692_s0 = scalar_lea.hbm %s883_s9, 64 }
 0x385   :  { %p693_p9 = scmp.ne.s32.totalorder %s883_s9, %s692_s0  ;;  %p696_p10 = scmp.lt.u32.totalorder %s692_s0, %s883_s9 }
 0x387   :  { %p698_p11 = pnand %p696_p10, %p693_p9 }
 0x389   :  { %701 = shalt.err (!%p698_p11)
}
 0x38a   :  { %401 = dma.vmem_to_hbm [thread:$0]  %s399_s23, 64, %s883_s9, [#allocation4]  }
 0x38b   :  { %708 = dma.done.wait [#allocation4], 64  }
 0x38c   :  { %709 = vsyncadd [#allocation4], 4294967232 }
 0x38d   :  { %405 = vsyncpa [#allocation3], 1 }
 0x38e   :  { %406 = vsyncpa [#allocation6], 1 }
 0x38f   :  { %407 = vsyncpa [#allocation9], 1 }
 0x390   :  { %408 = vsyncpa [#allocation4], 1 }

</bundles_post_ra>
